<compile_context>
chip_gen: v6e
topology: v6e:2x2x1
jax: 0.10.0
libtpu: 0.0.40
codegen_flags: <defaults>
</compile_context>

<pallas_src>
import functools

import jax
import jax.numpy as jnp
import numpy as np
from jax.experimental import pallas as pl
from jax.experimental.pallas import tpu as pltpu


def gat_kernel(inp_ref, w_ref, a1_ref, a2_ref, m_ref, rm_ref, out_ref, *,
               alpha, bt, mxu_dtype):
    W = w_ref[...].astype(mxu_dtype)     # [Fin, Fp]   (grid-invariant)
    a1t = a1_ref[...]                    # [N, Fp]     a[:Fout, :].T (pre-done)
    a2t = a2_ref[...]                    # [N, Fp]     a[Fout:, :].T (pre-done)
    M = m_ref[...].astype(mxu_dtype)     # [N, N]      M[i, j] = adj[j+1, i] > 0
    rmask = rm_ref[...]                  # [N, 1]      0.0 at row 0, else 1.0

    # Static unroll over the Bt batch elements of this block: plain 2-D MXU dots,
    # no batched dot_general / transposes to lower.
    for b in range(bt):
        x = inp_ref[b].astype(mxu_dtype)                         # [N, Fin]
        # h = x @ W ; h[0, :] = 0
        h = jnp.dot(x, W, preferred_element_type=jnp.float32)    # [N, Fp]
        h = h * rmask
        # neighbor sum: ns[i, :] = sum_j M[i, j] * h[j, :]
        ns = jnp.dot(M, h.astype(mxu_dtype),
                     preferred_element_type=jnp.float32)          # [N, Fp]
        # score_i = h_i . a1t_i + ns_i . a2t_i ; score_0 = 0
        score = jnp.sum(h * a1t + ns * a2t, axis=-1, keepdims=True) * rmask
        # attention rows are constant -> attn @ h == score * column_sum(h)
        h_prime = score * jnp.sum(h, axis=0, keepdims=True)       # [N, Fp]
        # LeakyReLU(alpha)
        out_ref[b] = jnp.where(h_prime > 0, h_prime, alpha * h_prime)


def graph_attention_forward(inp, W, a, adj, *, alpha=0.2, block_b=None,
                            pad_lanes=True, mxu_dtype=jnp.float32):
    """inp: [B, N, Fin], W: [Fin, Fout], a: [2*Fout, N], adj: [N, N] -> [B, N, Fout]."""
    B, N, Fin = inp.shape
    Fout = W.shape[1]

    # ---- batch-invariant precomputation, hoisted out of the grid loop ----
    a1t = a[:Fout, :].T                                            # [N, Fout]
    a2t = a[Fout:, :].T                                            # [N, Fout]
    # mask[i, j] = (adj[j+1, i] > 0) for j < N-1, zero for j = N-1
    mask = jnp.concatenate(
        [(adj[1:, :] > 0).astype(jnp.float32).T,
         jnp.zeros((N, 1), jnp.float32)], axis=1)                  # [N, N]
    rmask = (jnp.arange(N) != 0).astype(jnp.float32)[:, None]      # [N, 1]

    # ---- lane-dense output: zero-pad Fout to a multiple of 128 (exact) ----
    Fp = Fout
    if pad_lanes and Fout % 128 != 0:
        Fp = ((Fout + 127) // 128) * 128
        pad = ((0, 0), (0, Fp - Fout))
        W = jnp.pad(W, pad)
        a1t = jnp.pad(a1t, pad)
        a2t = jnp.pad(a2t, pad)

    # ---- batch elements per grid step (amortize per-step overhead) ----
    if block_b is None:
        block_b = next(d for d in range(min(B, 8), 0, -1) if B % d == 0)
    bt = block_b
    grid = (B // bt,)

    inp = inp.astype(jnp.float32)
    flops = B * N * (2 * Fin * Fp + 2 * N * Fp + 8 * Fp)
    bytes_accessed = 4 * (inp.size + W.size + a1t.size + a2t.size
                          + mask.size + rmask.size + B * N * Fp)

    kernel = functools.partial(gat_kernel, alpha=alpha, bt=bt,
                               mxu_dtype=mxu_dtype)
    # NOTE: for large N, set pltpu.CompilerParams(vmem_limit_bytes=...) — the only
    # NxN operand left is the mask, loaded once (constant index_map).
    out = pl.pallas_call(
        kernel,
        out_shape=jax.ShapeDtypeStruct((B, N, Fp), jnp.float32),
        grid=grid,
        in_specs=[
            pl.BlockSpec((bt, N, Fin), lambda b: (b, 0, 0)),
            pl.BlockSpec((Fin, Fp), lambda b: (0, 0)),
            pl.BlockSpec((N, Fp), lambda b: (0, 0)),
            pl.BlockSpec((N, Fp), lambda b: (0, 0)),
            pl.BlockSpec((N, N), lambda b: (0, 0)),
            pl.BlockSpec((N, 1), lambda b: (0, 0)),
        ],
        out_specs=pl.BlockSpec((bt, N, Fp), lambda b: (b, 0, 0)),
        compiler_params=pltpu.CompilerParams(
            dimension_semantics=("parallel",)),
        cost_estimate=pl.CostEstimate(flops=flops, transcendentals=0,
                                      bytes_accessed=bytes_accessed),
    )(inp, W, a1t, a2t, mask, rmask)

    if Fp != Fout:
        out = out[..., :Fout]
    return out


def reference_numpy(inp, W, a, adj, alpha=0.2):
    """Direct (loopy) translation of the torch forward, for verification."""
    inp, W, a, adj = (np.asarray(t, np.float32) for t in (inp, W, a, adj))
    B, N, Fin = inp.shape
    Fout = W.shape[1]
    h = inp @ W
    h[:, 0, :] = 0.0
    attention = np.zeros((B, N, N), np.float32)
    eye = np.eye(N, dtype=np.float32)
    for i in range(1, N):
        ac = a @ eye[i]                       # a[:, i], shape [2*Fout]
        index = np.where(adj[1:, i] > 0)[0]
        if index.size == 0:
            attention[:, i, :] = (h[:, i, :] @ ac[:Fout])[:, None]
        else:
            h1 = h[:, i, :]
            h2 = h[:, index, :].sum(axis=1)
            attention[:, i, :] = (np.concatenate([h1, h2], axis=1) @ ac)[:, None]
    h_prime = attention @ h
    return np.where(h_prime > 0, h_prime, alpha * h_prime)


def xavier_uniform(key, shape, gain):
    fan_in, fan_out = shape[0], shape[1]
    bound = gain * np.sqrt(6.0 / (fan_in + fan_out))
    return jax.random.uniform(key, shape, jnp.float32, -bound, bound)


if __name__ == "__main__":
    # Small deterministic problem: B=2 batches, N=8 nodes, Fin=16 -> Fout=32.
    B, N, Fin, Fout = 2, 8, 16, 32
    alpha = 0.2

    key = jax.random.PRNGKey(0)
    k_inp, k_adj, k_W, k_a = jax.random.split(key, 4)

    inp = jax.random.normal(k_inp, (B, N, Fin), jnp.float32)
    adj = (jax.random.uniform(k_adj, (N, N)) < 0.4).astype(jnp.float32)

    # Parameters (deterministic xavier-uniform init, gain=1.414, like __init__/MLP).
    # TODO(synk): torch re-initializes `a` randomly on every forward via MLP(N);
    #             here `a` is initialized once deterministically (dropout unused).
    W = xavier_uniform(k_W, (Fin, Fout), gain=1.414)
    a = xavier_uniform(k_a, (2 * Fout, N), gain=1.414)

    # f32 MXU operands keep the 1e-4 check exact; pass mxu_dtype=jnp.bfloat16 on
    # v6e/v7x for ~2-4x on the matmul-bound portion (f32 accumulation kept).
    out = graph_attention_forward(inp, W, a, adj, alpha=alpha,
                                  pad_lanes=True, mxu_dtype=jnp.float32)
    out = jax.block_until_ready(out)

    ref = reference_numpy(inp, W, a, adj, alpha=alpha)
    np.testing.assert_allclose(np.asarray(out), ref, rtol=1e-4, atol=1e-4)
    print("KERNEL_OK")
</pallas_src>

<mosaic_0001>
module attributes {stable_mosaic.version = 11 : i64} {
  func.func @gat_kernel(%arg0: i32, %arg1: memref<2x8x16xf32, #tpu.memory_space<vmem>>, %arg2: memref<16x128xf32, #tpu.memory_space<vmem>>, %arg3: memref<8x128xf32, #tpu.memory_space<vmem>>, %arg4: memref<8x128xf32, #tpu.memory_space<vmem>>, %arg5: memref<8x8xf32, #tpu.memory_space<vmem>>, %arg6: memref<8x1xf32, #tpu.memory_space<vmem>>, %arg7: memref<2x8x128xf32, #tpu.memory_space<vmem>>) attributes {dimension_semantics = [#tpu.dimension_semantics<parallel>], iteration_bounds = array<i64: 1>, scalar_prefetch = 0 : i64, scratch_operands = 0 : i64, tpu.core_type = #tpu.core_type<tc>, window_params = [{transform_indices = @transform_0, window_bounds = array<i64: 2, 8, 16>}, {pipeline_mode = #tpu.pipeline_mode<synchronous>, transform_indices = @transform_1, window_bounds = array<i64: 16, 128>}, {pipeline_mode = #tpu.pipeline_mode<synchronous>, transform_indices = @transform_2, window_bounds = array<i64: 8, 128>}, {pipeline_mode = #tpu.pipeline_mode<synchronous>, transform_indices = @transform_3, window_bounds = array<i64: 8, 128>}, {pipeline_mode = #tpu.pipeline_mode<synchronous>, transform_indices = @transform_4, window_bounds = array<i64: 8, 8>}, {pipeline_mode = #tpu.pipeline_mode<synchronous>, transform_indices = @transform_5, window_bounds = array<i64: 8, 1>}, {transform_indices = @transform_6, window_bounds = array<i64: 2, 8, 128>}]} {
    %c0 = arith.constant 0 : index
    %c0_0 = arith.constant 0 : index
    %0 = vector.load %arg2[%c0, %c0_0] : memref<16x128xf32, #tpu.memory_space<vmem>>, vector<16x128xf32>
    %c0_1 = arith.constant 0 : index
    %c0_2 = arith.constant 0 : index
    %1 = vector.load %arg3[%c0_1, %c0_2] : memref<8x128xf32, #tpu.memory_space<vmem>>, vector<8x128xf32>
    %c0_3 = arith.constant 0 : index
    %c0_4 = arith.constant 0 : index
    %2 = vector.load %arg4[%c0_3, %c0_4] : memref<8x128xf32, #tpu.memory_space<vmem>>, vector<8x128xf32>
    %c0_5 = arith.constant 0 : index
    %c0_6 = arith.constant 0 : index
    %3 = vector.load %arg5[%c0_5, %c0_6] : memref<8x8xf32, #tpu.memory_space<vmem>>, vector<8x8xf32>
    %c0_7 = arith.constant 0 : index
    %c0_8 = arith.constant 0 : index
    %4 = vector.load %arg6[%c0_7, %c0_8] : memref<8x1xf32, #tpu.memory_space<vmem>>, vector<8x1xf32>
    %c0_9 = arith.constant 0 : index
    %c0_10 = arith.constant 0 : index
    %c0_11 = arith.constant 0 : index
    %5 = vector.load %arg1[%c0_9, %c0_10, %c0_11] : memref<2x8x16xf32, #tpu.memory_space<vmem>>, vector<1x8x16xf32>
    %6 = vector.shape_cast %5 : vector<1x8x16xf32> to vector<8x16xf32>
    %cst = arith.constant dense<0.000000e+00> : vector<8x128xf32>
    %7 = tpu.matmul %6, %0, %cst {dimension_numbers = #tpu.dot_dimension_numbers<[1], [0], [0], [1], [0, 0, 1, 1], [], []>} : vector<8x16xf32>, vector<16x128xf32>, vector<8x128xf32> -> vector<8x128xf32>
    %8 = vector.broadcast %4 : vector<8x1xf32> to vector<8x128xf32>
    %9 = arith.mulf %7, %8 : vector<8x128xf32>
    %cst_12 = arith.constant dense<0.000000e+00> : vector<8x128xf32>
    %10 = tpu.matmul %3, %9, %cst_12 {dimension_numbers = #tpu.dot_dimension_numbers<[1], [0], [0], [1], [0, 0, 1, 1], [], []>} : vector<8x8xf32>, vector<8x128xf32>, vector<8x128xf32> -> vector<8x128xf32>
    %11 = arith.mulf %9, %1 : vector<8x128xf32>
    %12 = arith.mulf %10, %2 : vector<8x128xf32>
    %13 = arith.addf %11, %12 : vector<8x128xf32>
    %cst_13 = arith.constant dense<0.000000e+00> : vector<8xf32>
    %14 = vector.multi_reduction <add>, %13, %cst_13 [1] : vector<8x128xf32> to vector<8xf32>
    %15 = vector.shape_cast %14 : vector<8xf32> to vector<8x1xf32>
    %16 = arith.mulf %15, %4 : vector<8x1xf32>
    %cst_14 = arith.constant dense<0.000000e+00> : vector<128xf32>
    %17 = vector.multi_reduction <add>, %9, %cst_14 [0] : vector<8x128xf32> to vector<128xf32>
    %18 = vector.shape_cast %17 : vector<128xf32> to vector<1x128xf32>
    %19 = vector.broadcast %16 : vector<8x1xf32> to vector<8x128xf32>
    %20 = vector.broadcast %18 : vector<1x128xf32> to vector<8x128xf32>
    %21 = arith.mulf %19, %20 : vector<8x128xf32>
    %cst_15 = arith.constant 0.000000e+00 : f32
    %22 = vector.broadcast %cst_15 : f32 to vector<8x128xf32>
    %23 = arith.cmpf ogt, %21, %22 : vector<8x128xf32>
    %cst_16 = arith.constant 2.000000e-01 : f32
    %24 = vector.broadcast %cst_16 : f32 to vector<8x128xf32>
    %25 = arith.mulf %24, %21 : vector<8x128xf32>
    %26 = arith.select %23, %21, %25 : vector<8x128xi1>, vector<8x128xf32>
    %c0_17 = arith.constant 0 : index
    %c0_18 = arith.constant 0 : index
    %c0_19 = arith.constant 0 : index
    %27 = vector.load %arg7[%c0_17, %c0_18, %c0_19] : memref<2x8x128xf32, #tpu.memory_space<vmem>>, vector<1x8x128xf32>
    %28 = vector.shape_cast %27 : vector<1x8x128xf32> to vector<8x128xf32>
    %29 = vector.shape_cast %26 : vector<8x128xf32> to vector<1x8x128xf32>
    tpu.vector_store %arg7[%c0_17, %c0_18, %c0_19], %29 {strides = array<i32>} : memref<2x8x128xf32, #tpu.memory_space<vmem>>, vector<1x8x128xf32>,
    %c1 = arith.constant 1 : index
    %c0_20 = arith.constant 0 : index
    %c0_21 = arith.constant 0 : index
    %30 = vector.load %arg1[%c1, %c0_20, %c0_21] : memref<2x8x16xf32, #tpu.memory_space<vmem>>, vector<1x8x16xf32>
    %31 = vector.shape_cast %30 : vector<1x8x16xf32> to vector<8x16xf32>
    %cst_22 = arith.constant dense<0.000000e+00> : vector<8x128xf32>
    %32 = tpu.matmul %31, %0, %cst_22 {dimension_numbers = #tpu.dot_dimension_numbers<[1], [0], [0], [1], [0, 0, 1, 1], [], []>} : vector<8x16xf32>, vector<16x128xf32>, vector<8x128xf32> -> vector<8x128xf32>
    %33 = vector.broadcast %4 : vector<8x1xf32> to vector<8x128xf32>
    %34 = arith.mulf %32, %33 : vector<8x128xf32>
    %cst_23 = arith.constant dense<0.000000e+00> : vector<8x128xf32>
    %35 = tpu.matmul %3, %34, %cst_23 {dimension_numbers = #tpu.dot_dimension_numbers<[1], [0], [0], [1], [0, 0, 1, 1], [], []>} : vector<8x8xf32>, vector<8x128xf32>, vector<8x128xf32> -> vector<8x128xf32>
    %36 = arith.mulf %34, %1 : vector<8x128xf32>
    %37 = arith.mulf %35, %2 : vector<8x128xf32>
    %38 = arith.addf %36, %37 : vector<8x128xf32>
    %cst_24 = arith.constant dense<0.000000e+00> : vector<8xf32>
    %39 = vector.multi_reduction <add>, %38, %cst_24 [1] : vector<8x128xf32> to vector<8xf32>
    %40 = vector.shape_cast %39 : vector<8xf32> to vector<8x1xf32>
    %41 = arith.mulf %40, %4 : vector<8x1xf32>
    %cst_25 = arith.constant dense<0.000000e+00> : vector<128xf32>
    %42 = vector.multi_reduction <add>, %34, %cst_25 [0] : vector<8x128xf32> to vector<128xf32>
    %43 = vector.shape_cast %42 : vector<128xf32> to vector<1x128xf32>
    %44 = vector.broadcast %41 : vector<8x1xf32> to vector<8x128xf32>
    %45 = vector.broadcast %43 : vector<1x128xf32> to vector<8x128xf32>
    %46 = arith.mulf %44, %45 : vector<8x128xf32>
    %cst_26 = arith.constant 0.000000e+00 : f32
    %47 = vector.broadcast %cst_26 : f32 to vector<8x128xf32>
    %48 = arith.cmpf ogt, %46, %47 : vector<8x128xf32>
    %cst_27 = arith.constant 2.000000e-01 : f32
    %49 = vector.broadcast %cst_27 : f32 to vector<8x128xf32>
    %50 = arith.mulf %49, %46 : vector<8x128xf32>
    %51 = arith.select %48, %46, %50 : vector<8x128xi1>, vector<8x128xf32>
    %c1_28 = arith.constant 1 : index
    %c0_29 = arith.constant 0 : index
    %c0_30 = arith.constant 0 : index
    %52 = vector.load %arg7[%c1_28, %c0_29, %c0_30] : memref<2x8x128xf32, #tpu.memory_space<vmem>>, vector<1x8x128xf32>
    %53 = vector.shape_cast %52 : vector<1x8x128xf32> to vector<8x128xf32>
    %54 = vector.shape_cast %51 : vector<8x128xf32> to vector<1x8x128xf32>
    tpu.vector_store %arg7[%c1_28, %c0_29, %c0_30], %54 {strides = array<i32>} : memref<2x8x128xf32, #tpu.memory_space<vmem>>, vector<1x8x128xf32>,
    return
  }
  func.func @transform_0(%arg0: i32) -> (i32, i32, i32) {
    %c0_i32 = arith.constant 0 : i32
    %c0_i32_0 = arith.constant 0 : i32
    %c0_i32_1 = arith.constant 0 : i32
    return %arg0, %c0_i32, %c0_i32_0 : i32, i32, i32
  }
  func.func @transform_1(%arg0: i32) -> (i32, i32) {
    %c0_i32 = arith.constant 0 : i32
    %c0_i32_0 = arith.constant 0 : i32
    %c0_i32_1 = arith.constant 0 : i32
    return %c0_i32, %c0_i32_0 : i32, i32
  }
  func.func @transform_2(%arg0: i32) -> (i32, i32) {
    %c0_i32 = arith.constant 0 : i32
    %c0_i32_0 = arith.constant 0 : i32
    %c0_i32_1 = arith.constant 0 : i32
    return %c0_i32, %c0_i32_0 : i32, i32
  }
  func.func @transform_3(%arg0: i32) -> (i32, i32) {
    %c0_i32 = arith.constant 0 : i32
    %c0_i32_0 = arith.constant 0 : i32
    %c0_i32_1 = arith.constant 0 : i32
    return %c0_i32, %c0_i32_0 : i32, i32
  }
  func.func @transform_4(%arg0: i32) -> (i32, i32) {
    %c0_i32 = arith.constant 0 : i32
    %c0_i32_0 = arith.constant 0 : i32
    %c0_i32_1 = arith.constant 0 : i32
    return %c0_i32, %c0_i32_0 : i32, i32
  }
  func.func @transform_5(%arg0: i32) -> (i32, i32) {
    %c0_i32 = arith.constant 0 : i32
    %c0_i32_0 = arith.constant 0 : i32
    %c0_i32_1 = arith.constant 0 : i32
    return %c0_i32, %c0_i32_0 : i32, i32
  }
  func.func @transform_6(%arg0: i32) -> (i32, i32, i32) {
    %c0_i32 = arith.constant 0 : i32
    %c0_i32_0 = arith.constant 0 : i32
    %c0_i32_1 = arith.constant 0 : i32
    return %arg0, %c0_i32, %c0_i32_0 : i32, i32, i32
  }
}

</mosaic_0001>

<bundles_post_ra>
// kernel: tpu_custom_call.1
= control target key start
LH: loop header
LB: loop body
LE: loop exit
PB: predicated region body
PF: predicated region fallthrough
CT: control target
= control target key end

     0   :  { %11 = vsyncpa [#allocation3], 0  ;;  %s650_s0 = inlined_call_operand.hbm [shape: f32[2,8,16], index: 0, kind: input, shape index: {}]   ;;  %s651_s1 = inlined_call_operand.hbm [shape: f32[16,128], index: 1, kind: input, shape index: {}]   ;;  %s652_s2 = inlined_call_operand.vmem [shape: f32[8,128], index: 2, kind: input, shape index: {}]   ;;  %s653_s3 = inlined_call_operand.hbm [shape: f32[8,128], index: 3, kind: input, shape index: {}]   ;;  %s654_s4 = inlined_call_operand.vmem [shape: f32[8,8], index: 4, kind: input, shape index: {}]   ;;  %s655_s5 = inlined_call_operand.vmem [shape: f32[8,1], index: 5, kind: input, shape index: {}]   ;;  %s656_s6 = inlined_call_operand.hbm [shape: f32[2,8,128], index: 6, kind: output, shape index: {}]  }
   0x1   :  { %12 = vsyncpa [#allocation6], 0 }
   0x2   :  { %13 = vsyncpa [#allocation4], 0  ;;  %s568_s21 = smov [#allocation5]   ;;  %s569_s23 = smov [#allocation2]  }
   0x3   :  { %s31_s22 = sshll.u32 %s568_s21, 4  ;;  %s19_s24 = sshll.u32 %s569_s23, 4  ;;  %s32_s22 = int_to_ptr.vmem [resolvable:$true] %s31_s22  ;;  %s20_s24 = int_to_ptr.vmem [resolvable:$true] %s19_s24 }
   0x4   :  { %s490_s25 = scalar_lea.vmem %s32_s22, 256  ;;  %p495_p1 = scmp.lt.s32.totalorder %s32_s22, %s32_s22 }
   0x5   :  { %p491_p0 = scmp.ne.s32.totalorder %s32_s22, %s490_s25  ;;  %p496_p2 = scmp.lt.s32.totalorder %s490_s25, %s490_s25 }
   0x7   :  { %p497_p3 = por %p496_p2, %p495_p1 }
   0x9   :  { %p498_p4 = pnand %p497_p3, %p491_p0 }
   0xb   :  { %501 = shalt.err (!%p498_p4)
}
   0xc   :  { %s570_s26 = smov 128   ;;  %s571_s27 = smov 8  }
   0xd   :  { %37 = dma.hbm_to_vmem [thread:$0]  %s651_s1, 256, %s32_s22, [#allocation6], %s570_s26, %s570_s26, %s571_s27  }
   0xe   :  { %s510_s30 = scalar_lea.vmem %s20_s24, 256  ;;  %p515_p6 = scmp.lt.s32.totalorder %s20_s24, %s20_s24 }
   0xf   :  { %p511_p5 = scmp.ne.s32.totalorder %s20_s24, %s510_s30  ;;  %p516_p7 = scmp.lt.s32.totalorder %s510_s30, %s510_s30 }
  0x11   :  { %p517_p8 = por %p516_p7, %p515_p6 }
  0x13   :  { %p518_p9 = pnand %p517_p8, %p511_p5 }
  0x15   :  { %521 = shalt.err (!%p518_p9)
}
  0x16   :  { %25 = dma.hbm_to_vmem [thread:$0]  %s650_s0, 256, %s20_s24, [#allocation3], %s570_s26, %s570_s26, %s571_s27  }
  0x17   :  { %s572_s9 = smov [#allocation7]  }
  0x18   :  { %s46_s10 = sshll.u32 %s572_s9, 4  ;;  %s47_s10 = int_to_ptr.vmem [resolvable:$true] %s46_s10 }
  0x19   :  { %s530_s11 = scalar_lea.vmem %s47_s10, 128  ;;  %p535_p11 = scmp.lt.s32.totalorder %s47_s10, %s47_s10 }
  0x1a   :  { %p531_p10 = scmp.ne.s32.totalorder %s47_s10, %s530_s11  ;;  %p536_p12 = scmp.lt.s32.totalorder %s530_s11, %s530_s11 }
  0x1c   :  { %p537_p13 = por %p536_p12, %p535_p11 }
  0x1e   :  { %p538_p0 = pnand %p537_p13, %p531_p10 }
  0x20   :  { %541 = shalt.err (!%p538_p0)
}
  0x21   :  { %49 = dma.hbm_to_vmem [thread:$0]  %s653_s3, 128, %s47_s10, [#allocation6]  }
  0x22   :  { %562 = dma.done.wait [#allocation3], 256  }
  0x23   :  { %563 = vsyncadd [#allocation3], 4294967040 }
  0x24   :  { %564 = dma.done.wait [#allocation6], 384  }
  0x25   :  { %565 = vsyncadd [#allocation6], 4294966912  ;;  %v573_v0 = vmov 0.0   ;;  %vm574_vm0 = vmmov 0   ;;  %v575_v1 = vmov 0   ;;  %v64_v2 = vld [vmem:[#allocation5 + $0x8] sm:$0xff] }
  0x26   :  { %447 = vmatprep.subr.mxu0 %v573_v0  ;;  %451 = vmatprep.mubr.msk.f32.mxu0 %vm574_vm0, %v573_v0  ;;  %v63_v3 = vld [vmem:[#allocation5] sm:$0xff]  ;;  %v69_v4 = vld [vmem:[#allocation2] sm:$0xff]  ;;  %vm70_vm1 = vcmask 130048   ;;  %vm150_vm2 = vcmask 64512   ;;  %v247_v11 = vld [vmem:[#allocation2 + $0x8] sm:$0xff] }
  0x27   :  { %480 = vset.pattern.permute.xlu0 %v575_v1  ;;  %454 = vmatprep.subr.mxu1 %v573_v0  ;;  %v68_v5 = vld [vmem:[%s655_s5] sm:$0xff] }
  0x28   :  { %456 = vmatprep.mubr.msk.f32.mxu1 %vm574_vm0, %v573_v0  ;;  %481 = vset.pattern.permute.xlu1 %v575_v1  ;;  %v67_v9 = vld [vmem:[%s654_s4] sm:$0xff] }
  0x29   :  { %448 = vmatpush3.msra.mxu0 %v64_v2  ;;  %146 = vperm.xlu0 %480, %v68_v5   ;;  %v66_v12 = vld [vmem:[#allocation7] sm:$0xff] }
  0x2a   :  { %449 = vmatprep.subr.mxu0 %v573_v0  ;;  %v65_v13 = vld [vmem:[%s652_s2] sm:$0xff]  ;;  %s576_s2 = smov [#allocation8]  }
  0x2b   :  { %450 = vmatpush3.msra.mxu0 %v63_v3  ;;  %s420_s4 = sshll.u32 %s576_s2, 4  ;;  %s421_s4 = int_to_ptr.vmem [resolvable:$true] %s420_s4 }
  0x2c   :  { %452 = vmatmul.mubr.msk.f32.vlgmr.msra.gmra.mxu0 %vm70_vm1, %v69_v4  ;;  %466 = vmatprep.subr.mxu0 %v573_v0  ;;  %s542_s16 = scalar_lea.vmem %s421_s4, 256  ;;  %p547_p2 = scmp.lt.s32.totalorder %s421_s4, %s421_s4 }
  0x2d   :  { %468 = vmatprep.mubr.msk.f32.mxu0 %vm574_vm0, %v573_v0  ;;  %p543_p1 = scmp.ne.s32.totalorder %s421_s4, %s542_s16  ;;  %p548_p3 = scmp.lt.s32.totalorder %s542_s16, %s542_s16 }
  0x2f   :  { %p549_p4 = por %p548_p3, %p547_p2 }
  0x31   :  { %p550_p5 = pnand %p549_p4, %p543_p1 }
  0xa4   :  { %v147_v6 = vpop.permute.xlu0 %146 }
  0xec   :  { %v140_v7 = vpop.f32.mrf.mxu0 }
  0xed   :  { %v149_v8 = vmul.f32 %v147_v6, %v140_v7 }
  0xee   :  { %v453_v10 = vpop.f32.mrf.mxu0 }
  0xef   :  { %455 = vmatpush3.msra.mxu1 %v149_v8  ;;  %v224_v16 = vmul.f32 %v149_v8, %v65_v13  ;;  %v230_v29 = vrot.slane %v149_v8, 4 }
  0xf0   :  { %457 = vmatmul.mubr.msk.f32.vlgmr.msra.gmra.mxu1 %vm150_vm2, %v67_v9  ;;  %459 = vmatprep.subr.mxu1 %v573_v0 }
  0xf1   :  { %460 = vmatpush3.msra.mxu1 %v64_v2  ;;  %463 = vmatprep.mubr.msk.f32.mxu1 %vm574_vm0, %v573_v0  ;;  %v231_v30 = vadd.f32 %v230_v29, %v149_v8 }
  0xf2   :  { %461 = vmatprep.subr.mxu1 %v573_v0 }
  0xf3   :  { %462 = vmatpush3.msra.mxu1 %v63_v3  ;;  %v232_v31 = vrot.slane %v231_v30, 2 }
  0xf4   :  { %464 = vmatmul.mubr.msk.f32.vlgmr.msra.gmra.mxu1 %vm70_vm1, %v247_v11 }
  0xf5   :  { %v233_v32 = vadd.f32 %v232_v31, %v231_v30 }
  0xf7   :  { %v234_v33 = vrot.slane %v233_v32, 1 }
  0xf9   :  { %v235_v36 = vadd.f32 %v234_v33, %v233_v32 }
 0x1b0   :  { %v220_v14 = vpop.f32.mrf.mxu1 }
 0x1b1   :  { %v225_v15 = vmul.f32 %v220_v14, %v66_v12 }
 0x1b2   :  { %v458_v17 = vpop.f32.mrf.mxu1 }
 0x1b3   :  { %v226_v18 = vadd.f32 %v225_v15, %v224_v16 }
 0x1b4   :  { %v317_v19 = vpop.f32.mrf.mxu1 }
 0x1b5   :  { %v321_v20 = vmul.f32 %v317_v19, %v147_v6  ;;  %227 = vadd.xlane.f32.xlu0 %v226_v18 }
 0x1b6   :  { %v465_v21 = vpop.f32.mrf.mxu1 }
 0x1b7   :  { %467 = vmatpush3.msra.mxu0 %v321_v20  ;;  %v392_v24 = vmul.f32 %v321_v20, %v65_v13  ;;  %v398_v41 = vrot.slane %v321_v20, 4 }
 0x1b8   :  { %469 = vmatmul.mubr.msk.f32.vlgmr.msra.gmra.mxu0 %vm150_vm2, %v67_v9 }
 0x1b9   :  { %v399_v42 = vadd.f32 %v398_v41, %v321_v20 }
 0x1bb   :  { %v400_v43 = vrot.slane %v399_v42, 2 }
 0x1bd   :  { %v401_v44 = vadd.f32 %v400_v43, %v399_v42 }
 0x1bf   :  { %v402_v45 = vrot.slane %v401_v44, 1 }
 0x1c1   :  { %v403_v46 = vadd.f32 %v402_v45, %v401_v44 }
 0x23e   :  { %v228_v27 = vpop.xlane.xlu0 %227 }
 0x23f   :  { %v229_v28 = vmul.f32 %v228_v27, %v68_v5 }
 0x278   :  { %v388_v22 = vpop.f32.mrf.mxu0 }
 0x279   :  { %v393_v23 = vmul.f32 %v388_v22, %v66_v12 }
 0x27a   :  { %v470_v25 = vpop.f32.mrf.mxu0 }
 0x27b   :  { %v394_v26 = vadd.f32 %v393_v23, %v392_v24 }
 0x27d   :  { %395 = vadd.xlane.f32.xlu1 %v394_v26 }
 0x28e   :  { %238 = vperm.xlu1 %481, %v229_v28  }
 0x306   :  { %v396_v34 = vpop.xlane.xlu1 %395 }
 0x307   :  { %v397_v35 = vmul.f32 %v396_v34, %v68_v5 }
 0x309   :  { %406 = vperm.xlu1 %481, %v397_v35  }
 0x30a   :  { %v239_v37 = vpop.permute.xlu1 %238 }
 0x30b   :  { %v241_v38 = vmul.f32 %v239_v37, %v235_v36 }
 0x30d   :  { %vm242_vm3 = vcmp.gt.f32.partialorder %v241_v38, 0.0  ;;  %v243_v39 = vmul.f32 0.2, %v241_v38 }
 0x30f   :  { %v244_v40 = vsel %vm242_vm3, %v241_v38, %v243_v39 }
 0x310   :  { %245 = vst [vmem:[#allocation8] sm:$0xff] %v244_v40 }
 0x384   :  { %v407_v47 = vpop.permute.xlu1 %406 }
 0x385   :  { %v409_v48 = vmul.f32 %v407_v47, %v403_v46 }
 0x387   :  { %vm410_vm4 = vcmp.gt.f32.partialorder %v409_v48, 0.0  ;;  %v411_v49 = vmul.f32 0.2, %v409_v48 }
 0x389   :  { %v412_v50 = vsel %vm410_vm4, %v409_v48, %v411_v49 }
 0x38a   :  { %414 = vst [vmem:[#allocation8 + $0x8] sm:$0xff] %v412_v50 }
 0x38b   :  { %553 = shalt.err (!%p550_p5)
}
 0x38c   :  { %426 = dma.vmem_to_hbm [thread:$0]  %s421_s4, 256, %s656_s6, [#allocation4], %s570_s26, %s570_s26, %s571_s27  }
 0x38d   :  { %566 = dma.done.wait [#allocation4], 256  }
 0x38e   :  { %567 = vsyncadd [#allocation4], 4294967040 }
 0x38f   :  { %430 = vsyncpa [#allocation3], 1 }
 0x390   :  { %431 = vsyncpa [#allocation6], 1 }
 0x391   :  { %432 = vsyncpa [#allocation4], 1 }

</bundles_post_ra>
